<compile_context>
chip_gen: v6e
topology: v6e:2x2x1
jax: 0.10.0
libtpu: 0.0.40
codegen_flags: <defaults>
</compile_context>

<pallas_src>
import jax
import jax.numpy as jnp
from jax.experimental import pallas as pl
from jax.experimental.pallas import tpu as pltpu

IN_FEATURES = 256 * 4 * 4          # 4096, fixed by the module definition
OUT_FEATURES = 1                   # single discriminator logit

_MIN_GRID_STEPS = 4                # >= 2 steps per v7x TC + pipeline overlap


def _round_up(n, m):
    return ((n + m - 1) // m) * m


def _default_tile_b():
    """Generation-aware default batch tile (rows per grid step)."""
    try:
        kind = jax.devices()[0].device_kind.lower()
    except Exception:  # pragma: no cover - defensive; any failure -> safe default
        return 512
    if "v5" in kind:
        # ~0.82 TB/s: a 4 MiB tile already takes ~5 us, step overhead <7%.
        return 256
    # v6e / v7x: bigger tiles amortize the ~0.35 us per-grid-step overhead.
    return 1024


def _discriminator_kernel(x_ref, w_ref, b_ref, o_ref):
    """x:[TB,F]  w:[1,F]  b:[1,1]  o:[TB,1]   (all f32)."""
    # VPU elementwise multiply; weight row broadcasts over the sublane (batch) axis.
    prod = x_ref[...] * w_ref[...]
    # Reduce the 4096-wide feature axis -> one logit per batch row.
    logit = jnp.sum(prod, axis=-1, keepdims=True) + b_ref[...]
    # Exact sigmoid (exp on EUP; the lone divide is on a [TB,1] column).
    o_ref[...] = (1.0 / (1.0 + jnp.exp(-logit))).astype(o_ref.dtype)


def discriminator_forward(x, w, b, *, tile_b=None):
    """x:[B,4096] f32, w:[1,4096] f32 (PyTorch [out,in] layout), b:[1] f32 -> [B,1] f32."""
    B, F = x.shape
    assert F == IN_FEATURES
    assert w.shape == (OUT_FEATURES, IN_FEATURES)
    assert b.shape == (OUT_FEATURES,)

    if tile_b is None:
        tile_b = _default_tile_b()

    # Adaptive batch tile: multiple of 8 (f32 sublane), capped at tile_b, and
    # small enough that the "parallel" batch axis keeps >= _MIN_GRID_STEPS grid
    # steps once B is large enough (megacore sharding + DMA/compute overlap).
    TB = min(tile_b, _round_up(pl.cdiv(B, _MIN_GRID_STEPS), 8))
    TB = max(TB, 8)
    grid = (pl.cdiv(B, TB),)

    # Double-buffered x tile + resident weight/bias/output + slack; cap at
    # 40 MiB so the scoped budget stays inside v7x's 64 MiB physical VMEM.
    vmem_limit = min(max(2 * TB * F * 4 + (2 << 20), 16 << 20), 40 << 20)

    b2d = b.reshape(1, 1)

    out = pl.pallas_call(
        _discriminator_kernel,
        out_shape=jax.ShapeDtypeStruct((B, OUT_FEATURES), jnp.float32),
        grid=grid,
        in_specs=[
            pl.BlockSpec((TB, F), lambda i: (i, 0)),           # x tile, streamed
            pl.BlockSpec((1, F), lambda i: (0, 0)),            # weight, VMEM-resident
            pl.BlockSpec((1, 1), lambda i: (0, 0)),            # bias, VMEM-resident
        ],
        out_specs=pl.BlockSpec((TB, OUT_FEATURES), lambda i: (i, 0)),
        compiler_params=pltpu.CompilerParams(
            dimension_semantics=("parallel",),                 # independent batch tiles
            vmem_limit_bytes=vmem_limit,
        ),
    )(x, w, b2d)

    return out


def _reference_forward(x, w, b):
    return jax.nn.sigmoid(x @ w.T + b[None, :])


if __name__ == "__main__":
    key = jax.random.PRNGKey(0)
    kx, kw, kb = jax.random.split(key, 3)

    # Small, deliberately non-tile-aligned batch to exercise the masked
    # boundary block (no wrapper pad / slice anymore).
    B = 10
    # Input: flattened 256x4x4 feature map per sample (what the module consumes).
    x = jax.random.normal(kx, (B, IN_FEATURES), dtype=jnp.float32)

    # Deterministic parameter init (nn.Linear-style uniform bound 1/sqrt(fan_in)),
    # PyTorch weight layout [out_features, in_features].
    bound = 1.0 / (IN_FEATURES ** 0.5)
    w = jax.random.uniform(kw, (OUT_FEATURES, IN_FEATURES),
                           minval=-bound, maxval=bound, dtype=jnp.float32)
    b = jax.random.uniform(kb, (OUT_FEATURES,),
                           minval=-bound, maxval=bound, dtype=jnp.float32)

    out = discriminator_forward(x, w, b)
    out = jax.block_until_ready(out)

    ref = _reference_forward(x, w, b)
    assert out.shape == (B, OUT_FEATURES)
    assert jnp.allclose(out, ref, atol=2e-5, rtol=2e-5)

    print("KERNEL_OK")
</pallas_src>

<mosaic_0001>
module attributes {stable_mosaic.version = 11 : i64} {
  func.func @_discriminator_kernel(%arg0: i32, %arg1: memref<8x4096xf32, #tpu.memory_space<vmem>>, %arg2: memref<1x4096xf32, #tpu.memory_space<vmem>>, %arg3: memref<1x1xf32, #tpu.memory_space<vmem>>, %arg4: memref<8x1xf32, #tpu.memory_space<vmem>>) attributes {dimension_semantics = [#tpu.dimension_semantics<parallel>], iteration_bounds = array<i64: 2>, scalar_prefetch = 0 : i64, scratch_operands = 0 : i64, tpu.core_type = #tpu.core_type<tc>, window_params = [{transform_indices = @transform_0, window_bounds = array<i64: 8, 4096>}, {pipeline_mode = #tpu.pipeline_mode<synchronous>, transform_indices = @transform_1, window_bounds = array<i64: 1, 4096>}, {pipeline_mode = #tpu.pipeline_mode<synchronous>, transform_indices = @transform_2, window_bounds = array<i64: 1, 1>}, {transform_indices = @transform_3, window_bounds = array<i64: 8, 1>}]} {
    %c0 = arith.constant 0 : index
    %c0_0 = arith.constant 0 : index
    %0 = vector.load %arg1[%c0, %c0_0] : memref<8x4096xf32, #tpu.memory_space<vmem>>, vector<8x4096xf32>
    %c0_1 = arith.constant 0 : index
    %c0_2 = arith.constant 0 : index
    %1 = vector.load %arg2[%c0_1, %c0_2] : memref<1x4096xf32, #tpu.memory_space<vmem>>, vector<1x4096xf32>
    %2 = vector.broadcast %1 : vector<1x4096xf32> to vector<8x4096xf32>
    %3 = arith.mulf %0, %2 : vector<8x4096xf32>
    %cst = arith.constant dense<0.000000e+00> : vector<8xf32>
    %4 = vector.multi_reduction <add>, %3, %cst [1] : vector<8x4096xf32> to vector<8xf32>
    %5 = vector.shape_cast %4 : vector<8xf32> to vector<8x1xf32>
    %c0_3 = arith.constant 0 : index
    %c0_4 = arith.constant 0 : index
    %6 = vector.load %arg3[%c0_3, %c0_4] : memref<1x1xf32, #tpu.memory_space<vmem>>, vector<1x1xf32>
    %7 = vector.broadcast %6 : vector<1x1xf32> to vector<8x1xf32>
    %8 = arith.addf %5, %7 : vector<8x1xf32>
    %cst_5 = arith.constant 0.000000e+00 : f32
    %9 = vector.broadcast %cst_5 : f32 to vector<8x1xf32>
    %10 = arith.subf %9, %8 : vector<8x1xf32>
    %11 = math.exp %10 : vector<8x1xf32>
    %cst_6 = arith.constant 1.000000e+00 : f32
    %12 = vector.broadcast %cst_6 : f32 to vector<8x1xf32>
    %13 = arith.addf %12, %11 : vector<8x1xf32>
    %cst_7 = arith.constant 1.000000e+00 : f32
    %14 = vector.broadcast %cst_7 : f32 to vector<8x1xf32>
    %15 = arith.divf %14, %13 : vector<8x1xf32>
    %c0_8 = arith.constant 0 : index
    %c0_9 = arith.constant 0 : index
    %16 = vector.load %arg4[%c0_8, %c0_9] : memref<8x1xf32, #tpu.memory_space<vmem>>, vector<8x1xf32>
    tpu.vector_store %arg4[%c0_8, %c0_9], %15 {strides = array<i32>} : memref<8x1xf32, #tpu.memory_space<vmem>>, vector<8x1xf32>,
    return
  }
  func.func @transform_0(%arg0: i32) -> (i32, i32) {
    %c0_i32 = arith.constant 0 : i32
    %c0_i32_0 = arith.constant 0 : i32
    return %arg0, %c0_i32 : i32, i32
  }
  func.func @transform_1(%arg0: i32) -> (i32, i32) {
    %c0_i32 = arith.constant 0 : i32
    %c0_i32_0 = arith.constant 0 : i32
    %c0_i32_1 = arith.constant 0 : i32
    return %c0_i32, %c0_i32_0 : i32, i32
  }
  func.func @transform_2(%arg0: i32) -> (i32, i32) {
    %c0_i32 = arith.constant 0 : i32
    %c0_i32_0 = arith.constant 0 : i32
    %c0_i32_1 = arith.constant 0 : i32
    return %c0_i32, %c0_i32_0 : i32, i32
  }
  func.func @transform_3(%arg0: i32) -> (i32, i32) {
    %c0_i32 = arith.constant 0 : i32
    %c0_i32_0 = arith.constant 0 : i32
    return %arg0, %c0_i32 : i32, i32
  }
}

</mosaic_0001>

<bundles_post_ra>
// kernel: tpu_custom_call.1
= control target key start
LH: loop header
LB: loop body
LE: loop exit
PB: predicated region body
PF: predicated region fallthrough
CT: control target
= control target key end

     0   :  { %s954_s0 = inlined_call_operand.hbm [shape: f32[10,4096], index: 0, kind: input, shape index: {}]   ;;  %s955_s1 = inlined_call_operand.hbm [shape: f32[1,4096], index: 1, kind: input, shape index: {}]   ;;  %s956_s2 = inlined_call_operand.<no memory space> [shape: f32[1,1], index: 2, kind: input, shape index: {}]   ;;  %s957_s3 = inlined_call_operand.vmem [shape: f32[10,1], index: 3, kind: output, shape index: {}]  }
   0x1   :  { %v8_v0 = vstv %s956_s2 }
   0x2   :  { %9 = vst [vmem:[#allocation2] sm:$0x1] %v8_v0 }
   0x3   :  { %10 = vsyncpa [#allocation4], 0 }
   0x4   :  { %12 = vsyncpa [#allocation4 + $0x1], 0 }
   0x5   :  { %13 = vsyncpa [#allocation6], 0  ;;  %s746_s14 = smov 0   ;;  %s748_s15 = smov 0  }
   0x6   :  { %s750_s16 = smov 0   ;;  %s752_s17 = smov 0  }
   0x7 LB: > { %s765_s2 = sadd.s32 4294967295, %s719_s17   ;;  %p39_p0 = scmp.ne.s32.totalorder %s711_s15, %s707_s14  ;;  %s719_s17 = sphi %s752_s17, %s973_s17   ;;  %s715_s16 = sphi %s750_s16, %s972_s16   ;;  %s711_s15 = sphi %s748_s15, %s971_s15   ;;  %s707_s14 = sphi %s746_s14, %s970_s14  }
   0x8   : > { %p958_p1 = scmp.eq.s32.totalorder %s765_s2, 0  ;;  %p559_p2 = scmp.ge.s32.totalorder %s719_s17, 1 }
   0x9   : > { %p118_p3 = scmp.lt.s32.totalorder %s719_s17, 3  ;;  %s721_s20 = smov [#allocation5]  }
   0xa   : > { %p773_p4 = por %p958_p1, %p39_p0  ;;  %s131_s21 = sshll.u32 %s721_s20, 4  ;;  %s132_s21 = int_to_ptr.vmem [resolvable:$true] %s131_s21 }
   0xb   : > { %p777_p5 = pnand %p559_p2, %p118_p3  ;;  %s784_s22 = sadd.s32 1, %s719_s17  }
   0xc   : > { %s961_s18 = scalar_select %p773_p4, 1, 0 }
   0xd   : > { %s962_s19 = scalar_select %p777_p5, 1, 0 }
   0xe   : > { %p579_p6 = pneg %p777_p5  ;;  %s23_s24 = ssub.s32 %s719_s17, %s784_s22 }
   0xf   : > { %p794_p8 = scmp.eq.s32.totalorder %s23_s24, 0  ;;  %s26_s26 = sadd.s32 1, %s715_s16 }
  0x10   : > { %p788_p7 = pnand %p579_p6, %p958_p1  ;;  %p33_p9 = scmp.ne.s32.totalorder %s715_s16, %s711_s15 }
  0x11   : > { %s638_s27 = scalar_lea.vmem %s132_s21, 512  ;;  %p646_p0 = scmp.lt.s32.totalorder %s132_s21, %s132_s21 }
  0x12   : > { %p629_p10 = pneg %p788_p7  ;;  %p639_p11 = scmp.ne.s32.totalorder %s132_s21, %s638_s27 }
  0x13   : > { %p647_p2 = scmp.lt.s32.totalorder %s638_s27, %s638_s27 }
  0x14   : > { %p641_p12 = pnand %p639_p11, %p629_p10 }
  0x15   : > { %p648_p3 = por %p647_p2, %p646_p0 }
  0x16   : > { %p642_p13 = pneg %p641_p12 }
  0x18   : > { %p649_p6 = pnand %p648_p3, %p642_p13 }
  0x1a   : > { %652 = shalt.err (!%p649_p6)
}
  0x1b   : > { %582 = dma.hbm_to_vmem [thread:$0]  (!%p788_p7), %s955_s1, 512, %s132_s21, [#allocation6]  }
  0x1c   : > { %s811_s30 = scalar_select %p794_p8, %s715_s16, %s26_s26  }
  0x1d   : > { %p34_p10 = scmp.eq.s32.totalorder %s719_s17, 0  ;;  %p588_p11 = scmp.lt.s32.totalorder %s719_s17, 2 }
  0x1e   : > { %s145_s4 = sand.u32 1, %s715_s16   ;;  %s572_s5 = sshll.u32 %s719_s17, 12 }
  0x1f   : > { %p35_p12 = por %p34_p10, %p33_p9  ;;  %s562_s6 = sshll.u32 %s145_s4, 8 }
  0x20   : > { %s823_s9 = scalar_lea.hbm %s954_s0, %s572_s5  ;;  %s149_s11 = scalar_lea.vmem [#allocation3], %s562_s6 }
  0x21   : > { %p825_p13 = pnand %p588_p11, %p35_p12  ;;  %s157_s12 = sshll.u32 %s149_s11, 4  ;;  %s158_s12 = int_to_ptr.vmem [resolvable:$true] %s157_s12 }
  0x22   : > { %s146_s13 = scalar_lea.sflag [#allocation4], %s145_s4  ;;  %s653_s14 = scalar_lea.hbm %s823_s9, 4096 }
  0x23   : > { %p654_p7 = scmp.ne.s32.totalorder %s823_s9, %s653_s14  ;;  %p655_p8 = pneg %p825_p13 }
  0x24   : > { %s658_s21 = scalar_lea.hbm %s954_s0, 8192  ;;  %p659_p2 = scmp.lt.s32.totalorder %s823_s9, %s954_s0 }
  0x25   : > { %p656_p9 = pnand %p655_p8, %p654_p7  ;;  %p660_p3 = scmp.lt.s32.totalorder %s658_s21, %s653_s14 }
  0x27   : > { %p657_p0 = pneg %p656_p9  ;;  %p661_p6 = por %p660_p3, %p659_p2 }
  0x29   : > { %p662_p10 = pnand %p661_p6, %p657_p0 }
  0x2b   : > { %665 = shalt.err (!%p662_p10)
}
  0x2c   : > { %s666_s25 = scalar_lea.vmem %s158_s12, 4096  ;;  %s722_s26 = smov [#allocation3]  }
  0x2d   : > { %p667_p11 = scmp.ne.s32.totalorder %s158_s12, %s666_s25  ;;  %s671_s27 = sshll.u32 %s722_s26, 4  ;;  %s672_s27 = int_to_ptr.vmem [resolvable:$false] %s671_s27 }
  0x2e   : > { %s673_s28 = scalar_lea.vmem %s672_s27, 8192  ;;  %p674_p7 = scmp.lt.s32.totalorder %s158_s12, %s672_s27 }
  0x2f   : > { %p669_p12 = pnand %p667_p11, %p655_p8  ;;  %p675_p9 = scmp.lt.s32.totalorder %s673_s28, %s666_s25 }
  0x31   : > { %p670_p1 = pneg %p669_p12  ;;  %p676_p4 = por %p675_p9, %p674_p7 }
  0x33   : > { %p677_p5 = pnand %p676_p4, %p670_p1 }
  0x35   : > { %680 = shalt.err (!%p677_p5)
}
  0x36   : > { %586 = dma.hbm_to_vmem [thread:$0]  (!%p825_p13), %s823_s9, 4096, %s158_s12, %s146_s13  }
  0x37   : > { %p966_p0 = scmp.ne.s32.totalorder %s962_s19, 0 }
  0x38   : > { %s168_s29 = sand.u32 (!%p966_p0), 1, %s711_s15   ;;  %p967_p8 = scmp.ne.s32.totalorder (!%p966_p0), %s961_s18, 0 }
  0x39   : > { %166 = sbr.rel (%p966_p0) target bundleno = 313 (0x139), region = 32  ;;  %s566_s4 = sshll.u32 (!%p966_p0), %s168_s29, 8 }
  0x3a   : > { %s169_s5 = scalar_lea.sflag (!%p966_p0), [#allocation4], %s168_s29  ;;  %s846_s6 = scalar_lea.vmem (!%p966_p0), [#allocation3], %s566_s4 }
  0x3e   : > { %698 = dma.done.wait (%p967_p8), %s169_s5, 4096  }
  0x3f   : > { %700 = vsyncadd (%p967_p8), %s169_s5, 4294963200  ;;  %p968_p1 = scmp.eq.s32.totalorder %s765_s2, 0 }
  0x41   : > { %702 = dma.done.wait (%p968_p1), [#allocation6], 512   ;;  %p969_p4 = pmov %p968_p1 }
  0x42   : > { %v242_v1 = vlaneseq  ;;  %v234_v5 = vld [vmem:[#allocation5] sm:$0xff]  ;;  %v203_v11 = vld [vmem:[%s846_s6 + $0x8] sm:$0xff]  ;;  %v204_v14 = vld [vmem:[%s846_s6 + $0x10] sm:$0xff]  ;;  %p198_p5 = scmp.lt.s32.totalorder %s765_s2, 1  ;;  %vm481_vm0 = vcmask 7168  }
  0x43   : > { %704 = vsyncadd (%p969_p4), [#allocation6], 4294966784  ;;  %v202_v10 = vld [vmem:[%s846_s6] sm:$0xff]  ;;  %v205_v19 = vld [vmem:[%s846_s6 + $0x18] sm:$0xff] }
  0x44   : > { %v243_v2 = vshrl.u32 %v242_v1, 7  ;;  %v206_v23 = vld [vmem:[%s846_s6 + $0x20] sm:$0xff]  ;;  %v207_v28 = vld [vmem:[%s846_s6 + $0x28] sm:$0xff]  ;;  %v208_v32 = vld [vmem:[%s846_s6 + $0x30] sm:$0xff]  ;;  %s975_s2 = smov (!%p198_p5, %s765_s2), 1 }
  0x45   : > { %v235_v33 = vld [vmem:[#allocation5 + $0x8] sm:$0xff]  ;;  %v209_v37 = vld [vmem:[%s846_s6 + $0x38] sm:$0xff]  ;;  %v210_v41 = vld [vmem:[%s846_s6 + $0x40] sm:$0xff]  ;;  %s568_s18 = sshll.u32 %s975_s2, 3 }
  0x46   : > { %v856_v3 = vsub.s32 0, %v243_v2  ;;  %v858_v4 = vsub.s32 1, %v243_v2  ;;  %v860_v6 = vsub.s32 2, %v243_v2  ;;  %v864_v9 = vsub.s32 3, %v243_v2  ;;  %v211_v45 = vld [vmem:[%s846_s6 + $0x48] sm:$0xff]  ;;  %v212_v49 = vld [vmem:[%s846_s6 + $0x50] sm:$0xff]  ;;  %s201_s8 = scalar_lea.vmem %s957_s3, %s568_s18 }
  0x47   : > { %v869_v13 = vsub.s32 4, %v243_v2  ;;  %v873_v16 = vsub.s32 5, %v243_v2  ;;  %v877_v21 = vsub.s32 6, %v243_v2  ;;  %v881_v25 = vsub.s32 7, %v243_v2  ;;  %v213_v53 = vld [vmem:[%s846_s6 + $0x58] sm:$0xff]  ;;  %v214_v57 = vld [vmem:[%s846_s6 + $0x60] sm:$0xff] }
  0x48   : > { %v245_v7 = vrot.slane %v234_v5, %v856_v3  ;;  %v249_v8 = vrot.slane %v234_v5, %v858_v4  ;;  %v253_v12 = vrot.slane %v234_v5, %v860_v6  ;;  %v257_v15 = vrot.slane %v234_v5, %v864_v9  ;;  %v215_v61 = vld [vmem:[%s846_s6 + $0x68] sm:$0xff]  ;;  %v216_v1 = vld [vmem:[%s846_s6 + $0x70] sm:$0xff] }
  0x49   : > { %v261_v20 = vrot.slane %v234_v5, %v869_v13  ;;  %v265_v24 = vrot.slane %v234_v5, %v873_v16  ;;  %v269_v29 = vrot.slane %v234_v5, %v877_v21  ;;  %v273_v34 = vrot.slane %v234_v5, %v881_v25  ;;  %v236_v2 = vld [vmem:[#allocation5 + $0x10] sm:$0xff] }
  0x4a   : > { %v402_v17 = vmul.f32 %v245_v7, %v202_v10  ;;  %v403_v18 = vmul.f32 %v249_v8, %v203_v11  ;;  %v404_v22 = vmul.f32 %v253_v12, %v204_v14  ;;  %v405_v26 = vmul.f32 %v257_v15, %v205_v19  ;;  %v217_v10 = vld [vmem:[%s846_s6 + $0x78] sm:$0xff]  ;;  %v218_v15 = vld [vmem:[%s846_s6 + $0x80] sm:$0xff] }
  0x4b   : > { %v406_v30 = vmul.f32 %v261_v20, %v206_v23  ;;  %v407_v35 = vmul.f32 %v265_v24, %v207_v28  ;;  %v277_v38 = vrot.slane %v235_v33, %v856_v3  ;;  %v408_v39 = vmul.f32 %v269_v29, %v208_v32  ;;  %v219_v20 = vld [vmem:[%s846_s6 + $0x88] sm:$0xff] }
  0x4c   : > { %v434_v27 = vadd.f32 %v403_v18, %v402_v17  ;;  %v281_v42 = vrot.slane %v235_v33, %v858_v4  ;;  %v409_v43 = vmul.f32 %v273_v34, %v209_v37  ;;  %v285_v46 = vrot.slane %v235_v33, %v860_v6  ;;  %v222_v34 = vld [vmem:[%s846_s6 + $0xa0] sm:$0xff] }
  0x4d   : > { %v410_v47 = vmul.f32 %v277_v38, %v210_v41  ;;  %v289_v50 = vrot.slane %v235_v33, %v864_v9  ;;  %v293_v54 = vrot.slane %v235_v33, %v869_v13  ;;  %v297_v58 = vrot.slane %v235_v33, %v873_v16  ;;  %v223_v38 = vld [vmem:[%s846_s6 + $0xa8] sm:$0xff] }
  0x4e   : > { %v435_v31 = vadd.f32 %v434_v27, %v404_v22  ;;  %v411_v51 = vmul.f32 %v281_v42, %v211_v45  ;;  %v412_v55 = vmul.f32 %v285_v46, %v212_v49  ;;  %v301_v62 = vrot.slane %v235_v33, %v877_v21  ;;  %v224_v42 = vld [vmem:[%s846_s6 + $0xb0] sm:$0xff] }
  0x4f   : > { %v413_v59 = vmul.f32 %v289_v50, %v213_v53  ;;  %v414_v63 = vmul.f32 %v293_v54, %v214_v57  ;;  %v305_v5 = vrot.slane %v235_v33, %v881_v25  ;;  %v415_v7 = vmul.f32 %v297_v58, %v215_v61 }
  0x50   : > { %v436_v36 = vadd.f32 %v435_v31, %v405_v26  ;;  %v309_v11 = vrot.slane %v236_v2, %v856_v3  ;;  %v416_v12 = vmul.f32 %v301_v62, %v216_v1  ;;  %v313_v17 = vrot.slane %v236_v2, %v858_v4  ;;  %v220_v26 = vld [vmem:[%s846_s6 + $0x90] sm:$0xff]  ;;  %v229_v62 = vld [vmem:[%s846_s6 + $0xd8] sm:$0xff]  ;;  %v230_v1 = vld [vmem:[%s846_s6 + $0xe0] sm:$0xff] }
  0x51   : > { %v417_v18 = vmul.f32 %v305_v5, %v217_v10  ;;  %v317_v22 = vrot.slane %v236_v2, %v860_v6  ;;  %v321_v27 = vrot.slane %v236_v2, %v864_v9  ;;  %v325_v31 = vrot.slane %v236_v2, %v869_v13 }
  0x52   : > { %v437_v40 = vadd.f32 %v436_v36, %v406_v30  ;;  %v418_v23 = vmul.f32 %v309_v11, %v218_v15  ;;  %v419_v28 = vmul.f32 %v313_v17, %v219_v20  ;;  %v221_v30 = vld [vmem:[%s846_s6 + $0x98] sm:$0xff] }
  0x53   : > { %v420_v32 = vmul.f32 %v317_v22, %v220_v26  ;;  %v421_v36 = vmul.f32 %v321_v27, %v221_v30  ;;  %v233_v17 = vld [vmem:[%s846_s6 + $0xf8] sm:$0xff] }
  0x54   : > { %v438_v44 = vadd.f32 %v437_v40, %v407_v35  ;;  %v329_v35 = vrot.slane %v236_v2, %v873_v16  ;;  %v422_v40 = vmul.f32 %v325_v31, %v222_v34 }
  0x56   : > { %v439_v48 = vadd.f32 %v438_v44, %v408_v39  ;;  %v333_v39 = vrot.slane %v236_v2, %v877_v21  ;;  %v337_v44 = vrot.slane %v236_v2, %v881_v25  ;;  %v423_v45 = vmul.f32 %v329_v35, %v223_v38 }
  0x58   : > { %v440_v52 = vadd.f32 %v439_v48, %v409_v43  ;;  %v237_v43 = vld [vmem:[#allocation5 + $0x18] sm:$0xff]  ;;  %v424_v49 = vmul.f32 %v333_v39, %v224_v42 }
  0x59   : > { %v341_v48 = vrot.slane %v237_v43, %v856_v3  ;;  %v361_v2 = vrot.slane %v237_v43, %v873_v16 }
  0x5a   : > { %v441_v56 = vadd.f32 %v440_v52, %v410_v47  ;;  %v225_v47 = vld [vmem:[%s846_s6 + $0xb8] sm:$0xff]  ;;  %v345_v52 = vrot.slane %v237_v43, %v858_v4 }
  0x5b   : > { %v425_v53 = vmul.f32 %v337_v44, %v225_v47 }
  0x5c   : > { %v442_v60 = vadd.f32 %v441_v56, %v411_v51  ;;  %v226_v51 = vld [vmem:[%s846_s6 + $0xc0] sm:$0xff]  ;;  %v349_v56 = vrot.slane %v237_v43, %v860_v6  ;;  %v231_v6 = vld [vmem:[%s846_s6 + $0xe8] sm:$0xff] }
  0x5d   : > { %v426_v57 = vmul.f32 %v341_v48, %v226_v51 }
  0x5e   : > { %v443_v0 = vadd.f32 %v442_v60, %v412_v55  ;;  %v227_v55 = vld [vmem:[%s846_s6 + $0xc8] sm:$0xff]  ;;  %v353_v60 = vrot.slane %v237_v43, %v864_v9  ;;  %v369_v9 = vrot.slane %v237_v43, %v881_v25 }
  0x5f   : > { %v427_v61 = vmul.f32 %v345_v52, %v227_v55 }
  0x60   : > { %v444_v8 = vadd.f32 %v443_v0, %v413_v59  ;;  %v228_v59 = vld [vmem:[%s846_s6 + $0xd0] sm:$0xff]  ;;  %v429_v5 = vmul.f32 %v353_v60, %v229_v62 }
  0x61   : > { %v428_v0 = vmul.f32 %v349_v56, %v228_v59 }
  0x62   : > { %v445_v14 = vadd.f32 %v444_v8, %v414_v63  ;;  %v357_v63 = vrot.slane %v237_v43, %v869_v13  ;;  %v365_v8 = vrot.slane %v237_v43, %v877_v21 }
  0x64   : > { %v446_v19 = vadd.f32 %v445_v14, %v415_v7  ;;  %v430_v10 = vmul.f32 %v357_v63, %v230_v1  ;;  %v431_v14 = vmul.f32 %v361_v2, %v231_v6 }
  0x66   : > { %v447_v24 = vadd.f32 %v446_v19, %v416_v12  ;;  %v232_v12 = vld [vmem:[%s846_s6 + $0xf0] sm:$0xff]  ;;  %v433_v19 = vmul.f32 %v369_v9, %v233_v17 }
  0x67   : > { %v432_v13 = vmul.f32 %v365_v8, %v232_v12 }
  0x68   : > { %v448_v29 = vadd.f32 %v447_v24, %v417_v18 }
  0x6a   : > { %v449_v33 = vadd.f32 %v448_v29, %v418_v23  ;;  %v569_v23 = vld [vmem:[#allocation2] ss:$0 sm:$0xff] }
  0x6c   : > { %v450_v37 = vadd.f32 %v449_v33, %v419_v28 }
  0x6e   : > { %v451_v41 = vadd.f32 %v450_v37, %v420_v32 }
  0x70   : > { %v452_v46 = vadd.f32 %v451_v41, %v421_v36 }
  0x72   : > { %v453_v50 = vadd.f32 %v452_v46, %v422_v40 }
  0x74   : > { %v454_v54 = vadd.f32 %v453_v50, %v423_v45 }
  0x76   : > { %v455_v58 = vadd.f32 %v454_v54, %v424_v49 }
  0x78   : > { %v456_v3 = vadd.f32 %v455_v58, %v425_v53 }
  0x7a   : > { %v457_v4 = vadd.f32 %v456_v3, %v426_v57 }
  0x7c   : > { %v458_v7 = vadd.f32 %v457_v4, %v427_v61 }
  0x7e   : > { %v459_v11 = vadd.f32 %v458_v7, %v428_v0 }
  0x80   : > { %v460_v15 = vadd.f32 %v459_v11, %v429_v5 }
  0x82   : > { %v461_v18 = vadd.f32 %v460_v15, %v430_v10 }
  0x84   : > { %v462_v20 = vadd.f32 %v461_v18, %v431_v14 }
  0x86   : > { %v463_v16 = vadd.f32 %v462_v20, %v432_v13 }
  0x88   : > { %v464_v22 = vadd.f32 %v463_v16, %v433_v19 }
  0x8a   : > { %465 = vadd.xlane.f32.xlu0 %v464_v22 }
 0x113   : > { %v466_v24 = vpop.xlane.xlu0 %465 }
 0x114   : > { %v474_v21 = vadd.f32 %v569_v23, %v466_v24 }
 0x116   : > { %v475_v26 = vsub.f32 0.0, %v474_v21 }
 0x118   : > { %v476_v27 = vmul.f32 1.442695, %v475_v26 }
 0x11a   : > { %623 = vpow2.f32 %v476_v27 }
 0x127   : > { %v624_v28 = vpop.eup %623 }
 0x128   : > { %v478_v25 = vadd.f32 1.0, %v624_v28 }
 0x12a   : > { %625 = vrcp.f32 %v478_v25 }
 0x137   : > { %v626_v29 = vpop.eup %625 }
 0x138   : > { %482 = vst.msk [vmem:[%s201_s8] sm:$0xff] %vm481_vm0, %v626_v29 }
 0x139 PF: > { %p16_p13 = scmp.ge.s32.totalorder %s784_s22, 4   ;;  %s970_s14 = smov %s711_s15 }
 0x13a   : > { %s971_s15 = smov %s715_s16  ;;  %s972_s16 = smov %s811_s30 }
 0x13b   : > { %s973_s17 = smov %s784_s22  ;;  %18 = sbr.rel (!%p16_p13) target bundleno = 7 (0x7), region = 76 }
 0x140   :  { %502 = vsyncpa [#allocation4], 1 }
 0x141   :  { %504 = vsyncpa [#allocation4 + $0x1], 1 }
 0x142   :  { %505 = vsyncpa [#allocation6], 1 }

</bundles_post_ra>
